<compile_context>
chip_gen: v5e
topology: v5e:2x2
jax: 0.10.0
libtpu: 0.0.40
codegen_flags: <defaults>
</compile_context>

<pallas_src>
import jax
import jax.numpy as jnp
from jax.experimental import pallas as pl
from jax.experimental.pallas import tpu as pltpu


def _round_up(n, m):
    return (n + m - 1) // m * m


def supcon_head_kernel(x_ref, w1_ref, b1_ref, w2_ref, b2_ref, alpha_ref, o_ref):
    # ---- Linear(E, E): bf16 operands on the MXU, f32 accumulation
    h = jnp.dot(x_ref[...], w1_ref[...],
                preferred_element_type=jnp.float32) + b1_ref[...]

    # ---- PReLU (single learnable alpha; scalar lives in SMEM)
    alpha = alpha_ref[0, 0]
    h = jnp.where(h >= 0.0, h, alpha * h)

    # ---- BatchNorm1d (eval) is folded into W2/b2 in the wrapper.
    # ---- Dropout is identity in eval mode.

    # ---- Linear(E, P): bf16 operands, f32 accumulation
    z = jnp.dot(h.astype(jnp.bfloat16), w2_ref[...],
                preferred_element_type=jnp.float32) + b2_ref[...]

    # ---- F.normalize(z, p=2, dim=1) via rsqrt (EUP slot); padded columns are zero,
    #      so they do not contribute to the sum of squares.
    ss = jnp.sum(z * z, axis=-1, keepdims=True)
    o_ref[...] = z * jax.lax.rsqrt(jnp.maximum(ss, 1e-24))


def supcon_head_forward(x, params, *, block_rows=256):
    """x: (N, E) float32 -> (N, P) float32, L2-normalized rows.

    block_rows: batch tile; 256 keeps double-buffered tiles well inside v7x's
    64 MiB VMEM for E up to ~2k; 512-1024 is fine on v5e/v6e (128 MiB).
    """
    N, E = x.shape
    P = params["w2"].shape[1]

    E_pad = _round_up(E, 128)
    P_pad = _round_up(P, 128)
    TM = min(_round_up(block_rows, 8), _round_up(N, 8))
    N_pad = _round_up(N, TM)

    f32, bf16 = jnp.float32, jnp.bfloat16

    # Fold eval-mode BatchNorm1d into the second linear:
    #   BN(h) = h*s + t,  s = gamma*rsqrt(var+eps),  t = beta - mean*s
    #   z = BN(h) @ W2 + b2 = h @ (s[:,None]*W2) + (t @ W2 + b2)
    s = params["gamma"] * jax.lax.rsqrt(params["rvar"] + 1e-5)   # (1, E)
    t = params["beta"] - params["rmean"] * s                     # (1, E)
    w2_fold = s.reshape(E, 1) * params["w2"]                     # (E, P)
    b2_fold = t @ params["w2"] + params["b2"]                    # (1, P)

    # Zero-pad everything to lane-dense shapes. Zero weight rows/cols and zero bias
    # entries guarantee padded features/columns stay exactly zero.
    x_p = jnp.zeros((N_pad, E_pad), bf16).at[:N, :E].set(x.astype(bf16))
    w1_p = jnp.zeros((E_pad, E_pad), bf16).at[:E, :E].set(params["w1"].astype(bf16))
    b1_p = jnp.zeros((1, E_pad), f32).at[:, :E].set(params["b1"].astype(f32))
    w2_p = jnp.zeros((E_pad, P_pad), bf16).at[:E, :P].set(w2_fold.astype(bf16))
    b2_p = jnp.zeros((1, P_pad), f32).at[:, :P].set(b2_fold.astype(f32))
    alpha = params["alpha"].astype(f32).reshape(1, 1)

    grid = (N_pad // TM,)
    out = pl.pallas_call(
        supcon_head_kernel,
        out_shape=jax.ShapeDtypeStruct((N_pad, P_pad), jnp.float32),
        grid_spec=pltpu.PrefetchScalarGridSpec(
            num_scalar_prefetch=0,
            grid=grid,
            in_specs=[
                pl.BlockSpec((TM, E_pad), lambda i: (i, 0)),       # x tile (pipelined)
                pl.BlockSpec((E_pad, E_pad), lambda i: (0, 0)),    # W1 (resident)
                pl.BlockSpec((1, E_pad), lambda i: (0, 0)),        # b1 (resident)
                pl.BlockSpec((E_pad, P_pad), lambda i: (0, 0)),    # W2' (resident)
                pl.BlockSpec((1, P_pad), lambda i: (0, 0)),        # b2' (resident)
                pl.BlockSpec(memory_space=pltpu.MemorySpace.SMEM),  # PReLU alpha scalar
            ],
            out_specs=pl.BlockSpec((TM, P_pad), lambda i: (i, 0)),
        ),
        compiler_params=pltpu.CompilerParams(
            dimension_semantics=("parallel",),
        ),
    )(x_p, w1_p, b1_p, w2_p, b2_p, alpha)

    return out[:N, :P]


def init_params(key, embedding_dim, projection_dim):
    """Deterministic synthetic parameters matching the PyTorch module's shapes.
    BatchNorm stats/affine are made non-trivial so the BN fold is exercised."""
    k1, k2, k3, k4, k5, k6, k7, k8 = jax.random.split(key, 8)
    E, Pdim = embedding_dim, projection_dim
    lim1 = 1.0 / jnp.sqrt(E)
    w1 = jax.random.uniform(k1, (E, E), jnp.float32, -lim1, lim1)   # stored (in, out)
    b1 = jax.random.uniform(k2, (1, E), jnp.float32, -lim1, lim1)
    alpha = jnp.full((1, 1), 0.25, jnp.float32)                     # nn.PReLU() default
    gamma = jax.random.uniform(k5, (1, E), jnp.float32, 0.5, 1.5)
    beta = 0.1 * jax.random.normal(k6, (1, E), jnp.float32)
    rmean = 0.1 * jax.random.normal(k7, (1, E), jnp.float32)
    rvar = jax.random.uniform(k8, (1, E), jnp.float32, 0.5, 1.5)
    lim2 = 1.0 / jnp.sqrt(E)
    w2 = jax.random.uniform(k3, (E, Pdim), jnp.float32, -lim2, lim2)  # stored (in, out)
    b2 = jax.random.uniform(k4, (1, Pdim), jnp.float32, -lim2, lim2)
    return dict(w1=w1, b1=b1, alpha=alpha, gamma=gamma, beta=beta,
                rmean=rmean, rvar=rvar, w2=w2, b2=b2)


def reference_forward_f32(x, params):
    """Pure-JAX, full-f32, PyTorch-faithful reference (eval mode)."""
    h = x @ params["w1"] + params["b1"]
    a = params["alpha"][0, 0]
    h = jnp.where(h >= 0, h, a * h)
    h = (h - params["rmean"]) * jax.lax.rsqrt(params["rvar"] + 1e-5)
    h = h * params["gamma"] + params["beta"]
    z = h @ params["w2"] + params["b2"]
    n = jnp.sqrt(jnp.sum(z * z, axis=1, keepdims=True))
    return z / jnp.maximum(n, 1e-12)


def reference_forward_bf16(x, params):
    """Reference that emulates the kernel's numerics (bf16 MXU operands, f32
    accumulation, BN folded into the second linear) for a tight comparison."""
    bf16 = jnp.bfloat16
    E = x.shape[1]
    s = params["gamma"] * jax.lax.rsqrt(params["rvar"] + 1e-5)
    t = params["beta"] - params["rmean"] * s
    w2_fold = (s.reshape(E, 1) * params["w2"]).astype(bf16)
    b2_fold = (t @ params["w2"] + params["b2"]).astype(jnp.float32)
    h = jnp.dot(x.astype(bf16), params["w1"].astype(bf16),
                preferred_element_type=jnp.float32) + params["b1"]
    a = params["alpha"][0, 0]
    h = jnp.where(h >= 0, h, a * h)
    z = jnp.dot(h.astype(bf16), w2_fold,
                preferred_element_type=jnp.float32) + b2_fold
    ss = jnp.sum(z * z, axis=1, keepdims=True)
    return z * jax.lax.rsqrt(jnp.maximum(ss, 1e-24))


if __name__ == "__main__":
    key = jax.random.PRNGKey(0)
    kx, kp = jax.random.split(key)

    N, E, P = 8, 32, 16          # batch, embedding_dim, projection_dim (small test)
    x = jax.random.normal(kx, (N, E), jnp.float32)
    params = init_params(kp, E, P)

    out = supcon_head_forward(x, params)
    out = jax.block_until_ready(out)
    assert out.shape == (N, P)

    # Tight check vs a reference with matching bf16/f32 numerics.
    ref_tight = reference_forward_bf16(x, params)
    assert jnp.allclose(out, ref_tight, atol=1e-3, rtol=1e-3), \
        "mismatch vs bf16-emulated reference"

    # Loose check vs the full-f32 PyTorch-faithful reference (bf16 quantization only).
    ref_f32 = reference_forward_f32(x, params)
    assert jnp.allclose(out, ref_f32, atol=2e-2, rtol=2e-2), \
        "mismatch vs f32 reference"

    # Rows should be unit-norm.
    assert jnp.allclose(jnp.linalg.norm(out, axis=1), 1.0, atol=1e-3)

    print("KERNEL_OK")
</pallas_src>

<mosaic_0001>
module attributes {stable_mosaic.version = 11 : i64} {
  func.func @supcon_head_kernel(%arg0: i32, %arg1: memref<8x128xbf16, #tpu.memory_space<vmem>>, %arg2: memref<128x128xbf16, #tpu.memory_space<vmem>>, %arg3: memref<1x128xf32, #tpu.memory_space<vmem>>, %arg4: memref<128x128xbf16, #tpu.memory_space<vmem>>, %arg5: memref<1x128xf32, #tpu.memory_space<vmem>>, %arg6: memref<1x1xf32, #tpu.memory_space<smem>>, %arg7: memref<8x128xf32, #tpu.memory_space<vmem>>) attributes {dimension_semantics = [#tpu.dimension_semantics<parallel>], iteration_bounds = array<i64: 1>, scalar_prefetch = 0 : i64, scratch_operands = 0 : i64, tpu.core_type = #tpu.core_type<tc>, window_params = [{transform_indices = @transform_0, window_bounds = array<i64: 8, 128>}, {pipeline_mode = #tpu.pipeline_mode<synchronous>, transform_indices = @transform_1, window_bounds = array<i64: 128, 128>}, {pipeline_mode = #tpu.pipeline_mode<synchronous>, transform_indices = @transform_2, window_bounds = array<i64: 1, 128>}, {pipeline_mode = #tpu.pipeline_mode<synchronous>, transform_indices = @transform_3, window_bounds = array<i64: 128, 128>}, {pipeline_mode = #tpu.pipeline_mode<synchronous>, transform_indices = @transform_4, window_bounds = array<i64: 1, 128>}, {transform_indices = @transform_5, window_bounds = array<i64: 1, 1>}, {transform_indices = @transform_6, window_bounds = array<i64: 8, 128>}]} {
    %c0 = arith.constant 0 : index
    %c0_0 = arith.constant 0 : index
    %0 = vector.load %arg1[%c0, %c0_0] : memref<8x128xbf16, #tpu.memory_space<vmem>>, vector<8x128xbf16>
    %c0_1 = arith.constant 0 : index
    %c0_2 = arith.constant 0 : index
    %1 = vector.load %arg2[%c0_1, %c0_2] : memref<128x128xbf16, #tpu.memory_space<vmem>>, vector<128x128xbf16>
    %cst = arith.constant dense<0.000000e+00> : vector<8x128xf32>
    %2 = tpu.matmul %0, %1, %cst {dimension_numbers = #tpu.dot_dimension_numbers<[1], [0], [0], [1], [0, 0, 1, 1], [], []>} : vector<8x128xbf16>, vector<128x128xbf16>, vector<8x128xf32> -> vector<8x128xf32>
    %c0_3 = arith.constant 0 : index
    %c0_4 = arith.constant 0 : index
    %3 = vector.load %arg3[%c0_3, %c0_4] : memref<1x128xf32, #tpu.memory_space<vmem>>, vector<1x128xf32>
    %4 = vector.broadcast %3 : vector<1x128xf32> to vector<8x128xf32>
    %5 = arith.addf %2, %4 : vector<8x128xf32>
    %c0_5 = arith.constant 0 : index
    %c0_6 = arith.constant 0 : index
    %6 = memref.load %arg6[%c0_5, %c0_6] : memref<1x1xf32, #tpu.memory_space<smem>>
    %cst_7 = arith.constant 0.000000e+00 : f32
    %7 = vector.broadcast %cst_7 : f32 to vector<8x128xf32>
    %8 = arith.cmpf oge, %5, %7 : vector<8x128xf32>
    %9 = vector.broadcast %6 : f32 to vector<8x128xf32>
    %10 = arith.mulf %9, %5 : vector<8x128xf32>
    %11 = arith.select %8, %5, %10 : vector<8x128xi1>, vector<8x128xf32>
    %12 = arith.truncf %11 : vector<8x128xf32> to vector<8x128xbf16>
    %c0_8 = arith.constant 0 : index
    %c0_9 = arith.constant 0 : index
    %13 = vector.load %arg4[%c0_8, %c0_9] : memref<128x128xbf16, #tpu.memory_space<vmem>>, vector<128x128xbf16>
    %cst_10 = arith.constant dense<0.000000e+00> : vector<8x128xf32>
    %14 = tpu.matmul %12, %13, %cst_10 {dimension_numbers = #tpu.dot_dimension_numbers<[1], [0], [0], [1], [0, 0, 1, 1], [], []>} : vector<8x128xbf16>, vector<128x128xbf16>, vector<8x128xf32> -> vector<8x128xf32>
    %c0_11 = arith.constant 0 : index
    %c0_12 = arith.constant 0 : index
    %15 = vector.load %arg5[%c0_11, %c0_12] : memref<1x128xf32, #tpu.memory_space<vmem>>, vector<1x128xf32>
    %16 = vector.broadcast %15 : vector<1x128xf32> to vector<8x128xf32>
    %17 = arith.addf %14, %16 : vector<8x128xf32>
    %18 = arith.mulf %17, %17 : vector<8x128xf32>
    %cst_13 = arith.constant dense<0.000000e+00> : vector<8xf32>
    %19 = vector.multi_reduction <add>, %18, %cst_13 [1] : vector<8x128xf32> to vector<8xf32>
    %20 = vector.shape_cast %19 : vector<8xf32> to vector<8x1xf32>
    %cst_14 = arith.constant 1.000000e-24 : f32
    %21 = vector.broadcast %cst_14 : f32 to vector<8x1xf32>
    %22 = arith.maximumf %20, %21 : vector<8x1xf32>
    %23 = math.rsqrt %22 : vector<8x1xf32>
    %24 = vector.broadcast %23 : vector<8x1xf32> to vector<8x128xf32>
    %25 = arith.mulf %17, %24 : vector<8x128xf32>
    %c0_15 = arith.constant 0 : index
    %c0_16 = arith.constant 0 : index
    %26 = vector.load %arg7[%c0_15, %c0_16] : memref<8x128xf32, #tpu.memory_space<vmem>>, vector<8x128xf32>
    tpu.vector_store %arg7[%c0_15, %c0_16], %25 {strides = array<i32>} : memref<8x128xf32, #tpu.memory_space<vmem>>, vector<8x128xf32>,
    return
  }
  func.func @transform_0(%arg0: i32) -> (i32, i32) {
    %c0_i32 = arith.constant 0 : i32
    %c0_i32_0 = arith.constant 0 : i32
    return %arg0, %c0_i32 : i32, i32
  }
  func.func @transform_1(%arg0: i32) -> (i32, i32) {
    %c0_i32 = arith.constant 0 : i32
    %c0_i32_0 = arith.constant 0 : i32
    %c0_i32_1 = arith.constant 0 : i32
    return %c0_i32, %c0_i32_0 : i32, i32
  }
  func.func @transform_2(%arg0: i32) -> (i32, i32) {
    %c0_i32 = arith.constant 0 : i32
    %c0_i32_0 = arith.constant 0 : i32
    %c0_i32_1 = arith.constant 0 : i32
    return %c0_i32, %c0_i32_0 : i32, i32
  }
  func.func @transform_3(%arg0: i32) -> (i32, i32) {
    %c0_i32 = arith.constant 0 : i32
    %c0_i32_0 = arith.constant 0 : i32
    %c0_i32_1 = arith.constant 0 : i32
    return %c0_i32, %c0_i32_0 : i32, i32
  }
  func.func @transform_4(%arg0: i32) -> (i32, i32) {
    %c0_i32 = arith.constant 0 : i32
    %c0_i32_0 = arith.constant 0 : i32
    %c0_i32_1 = arith.constant 0 : i32
    return %c0_i32, %c0_i32_0 : i32, i32
  }
  func.func @transform_5(%arg0: i32) -> (i32, i32) {
    %c0_i32 = arith.constant 0 : i32
    %c0_i32_0 = arith.constant 0 : i32
    %c0_i32_1 = arith.constant 0 : i32
    return %c0_i32, %c0_i32_0 : i32, i32
  }
  func.func @transform_6(%arg0: i32) -> (i32, i32) {
    %c0_i32 = arith.constant 0 : i32
    %c0_i32_0 = arith.constant 0 : i32
    return %arg0, %c0_i32 : i32, i32
  }
}

</mosaic_0001>

<bundles_post_ra>
// kernel: tpu_custom_call.1
= control target key start
LH: loop header
LB: loop body
LE: loop exit
PB: predicated region body
PF: predicated region fallthrough
CT: control target
= control target key end

     0   :  { %12 = vsyncpa [#allocation4], 0  ;;  %s527_s0 = inlined_call_operand.hbm [shape: bf16[8,128], index: 0, kind: input, shape index: {}]   ;;  %s528_s1 = inlined_call_operand.hbm [shape: bf16[128,128], index: 1, kind: input, shape index: {}]   ;;  %s529_s2 = inlined_call_operand.vmem [shape: f32[1,128], index: 2, kind: input, shape index: {}]   ;;  %s530_s3 = inlined_call_operand.hbm [shape: bf16[128,128], index: 3, kind: input, shape index: {}]   ;;  %s531_s4 = inlined_call_operand.vmem [shape: f32[1,128], index: 4, kind: input, shape index: {}]   ;;  %s532_s5 = inlined_call_operand.<no memory space> [shape: f32[1,1], index: 5, kind: input, shape index: {}]   ;;  %s533_s6 = inlined_call_operand.hbm [shape: f32[8,128], index: 6, kind: output, shape index: {}]  }
   0x1   :  { %13 = vsyncpa [#allocation7], 0  ;;  %s30_s23 = sshll.u32 %s528_s1, 4  ;;  %s31_s23 = int_to_ptr.hbm [resolvable:$true] %s30_s23 }
   0x2   :  { %14 = vsyncpa [#allocation5], 0  ;;  %s465_s24 = smov [#allocation6]   ;;  %s20_s28 = sshll.u32 %s527_s0, 4  ;;  %s21_s28 = int_to_ptr.hbm [resolvable:$true] %s20_s28 }
   0x3   :  { %s32_s25 = sshll.u32 %s465_s24, 4  ;;  %s466_s29 = smov 64   ;;  %s33_s25 = int_to_ptr.vmem [resolvable:$true] %s32_s25 }
   0x4   :  { %s467_s30 = smov 4   ;;  %s468_s7 = smov [#allocation3]  }
   0x5   :  { %38 = dma.hbm_to_vmem [thread:$0]  %s31_s23, 1024, %s33_s25, [#allocation7], %s466_s29, %s466_s29, %s467_s30  }
   0x6   :  { %s22_s8 = sshll.u32 %s468_s7, 4  ;;  %s45_s11 = sshll.u32 %s530_s3, 4  ;;  %s23_s8 = int_to_ptr.vmem [resolvable:$true] %s22_s8  ;;  %s46_s11 = int_to_ptr.hbm [resolvable:$true] %s45_s11 }
   0x7   :  { %25 = dma.hbm_to_vmem [thread:$0]  %s21_s28, 64, %s23_s8, [#allocation4]  }
   0x8   :  { %s469_s1 = smov [#allocation8]  }
   0x9   :  { %s47_s12 = sshll.u32 %s469_s1, 4  ;;  %s48_s12 = int_to_ptr.vmem [resolvable:$true] %s47_s12 }
   0xa   :  { %53 = dma.hbm_to_vmem [thread:$0]  %s46_s11, 1024, %s48_s12, [#allocation7], %s466_s29, %s466_s29, %s467_s30  }
   0xb   :  { %459 = dma.done.wait [#allocation4], 64  }
   0xc   :  { %460 = vsyncadd [#allocation4], 4294967232 }
   0xd   :  { %461 = dma.done.wait [#allocation7], 2048  }
   0xe   :  { %462 = vsyncadd [#allocation7], 4294965248  ;;  %v344_v0 = vld [vmem:[#allocation6 + $0x38] sm:$0xff]  ;;  %v343_v1 = vld [vmem:[#allocation6 + $0x30] sm:$0xff]  ;;  %v154_v19 = vstv %s532_s5  ;;  %s262_s18 = sshll.u32 %s533_s6, 4  ;;  %s263_s18 = int_to_ptr.hbm [resolvable:$true] %s262_s18 }
   0xf   :  { %139 = vmatpush.bf16.msra.mxu0 %v344_v0  ;;  %v352_v2 = vld [vmem:[#allocation8 + $0x38] sm:$0xff]  ;;  %v351_v3 = vld [vmem:[#allocation8 + $0x30] sm:$0xff]  ;;  %v342_v4 = vld [vmem:[#allocation6 + $0x28] sm:$0xff] }
  0x10   :  { %226 = vmatpush.bf16.msra.mxu1 %v352_v2  ;;  %v350_v5 = vld [vmem:[#allocation8 + $0x28] sm:$0xff]  ;;  %v341_v6 = vld [vmem:[#allocation6 + $0x20] sm:$0xff]  ;;  %v340_v8 = vld [vmem:[#allocation6 + $0x18] sm:$0xff] }
  0x11   :  { %v349_v7 = vld [vmem:[#allocation8 + $0x20] sm:$0xff]  ;;  %v348_v9 = vld [vmem:[#allocation8 + $0x18] sm:$0xff]  ;;  %v339_v10 = vld [vmem:[#allocation6 + $0x10] sm:$0xff] }
  0x12   :  { %v347_v11 = vld [vmem:[#allocation8 + $0x10] sm:$0xff]  ;;  %v338_v12 = vld [vmem:[#allocation6 + $0x8] sm:$0xff]  ;;  %v337_v13 = vld [vmem:[#allocation6] sm:$0xff] }
  0x13   :  { %140 = vmatpush.bf16.msra.mxu0 %v343_v1  ;;  %v70_v14 = vld [vmem:[#allocation3] sm:$0xf]  ;;  %v346_v15 = vld [vmem:[#allocation8 + $0x8] sm:$0xff]  ;;  %v345_v16 = vld [vmem:[#allocation8] sm:$0xff] }
  0x14   :  { %227 = vmatpush.bf16.msra.mxu1 %v351_v3  ;;  %v359_v17 = vld [vmem:[%s529_s2] ss:$0 sm:$0xff]  ;;  %s470_s2 = smov [#allocation9]  }
  0x15   :  { %v360_v25 = vld [vmem:[%s531_s4] ss:$0 sm:$0xff]  ;;  %s260_s5 = sshll.u32 %s470_s2, 4  ;;  %s261_s5 = int_to_ptr.vmem [resolvable:$true] %s260_s5 }
  0x17   :  { %141 = vmatpush.bf16.msra.mxu0 %v342_v4 }
  0x18   :  { %228 = vmatpush.bf16.msra.mxu1 %v350_v5 }
  0x1b   :  { %142 = vmatpush.bf16.msra.mxu0 %v341_v6 }
  0x1c   :  { %229 = vmatpush.bf16.msra.mxu1 %v349_v7 }
  0x1f   :  { %143 = vmatpush.bf16.msra.mxu0 %v340_v8 }
  0x20   :  { %230 = vmatpush.bf16.msra.mxu1 %v348_v9 }
  0x23   :  { %144 = vmatpush.bf16.msra.mxu0 %v339_v10 }
  0x24   :  { %231 = vmatpush.bf16.msra.mxu1 %v347_v11 }
  0x27   :  { %145 = vmatpush.bf16.msra.mxu0 %v338_v12 }
  0x28   :  { %232 = vmatpush.bf16.msra.mxu1 %v346_v15 }
  0x2b   :  { %146 = vmatpush.bf16.msra.mxu0 %v337_v13 }
  0x2c   :  { %233 = vmatpush.bf16.msra.mxu1 %v345_v16 }
  0x2e   :  { %147 = vmatmul.bf16.vlgmr.msra.gmra.mxu0 %v70_v14 }
  0xab   :  { %v148_v18 = vpop.f32.mrf.mxu0 }
  0xac   :  { %v149_v20 = vadd.f32 %v359_v17, %v148_v18 }
  0xae   :  { %v155_v21 = vmul.f32 %v154_v19, %v149_v20  ;;  %vm153_vm0 = vcmp.ge.f32.partialorder %v149_v20, 0.0 }
  0xb0   :  { %v156_v22 = vsel %vm153_vm0, %v149_v20, %v155_v21 }
  0xb1   :  { %v157_v23 = vpack.c.bf16 %v156_v22, %v156_v22 }
  0xb3   :  { %v150_v24 = vpop.f32.mrf.mxu0  ;;  %234 = vmatmul.bf16.vlgmr.msra.gmra.mxu1 %v157_v23 }
 0x130   :  { %v235_v26 = vpop.f32.mrf.mxu1 }
 0x131   :  { %v236_v27 = vadd.f32 %v360_v25, %v235_v26 }
 0x133   :  { %v239_v28 = vmul.f32 %v236_v27, %v236_v27 }
 0x135   :  { %240 = vadd.xlane.f32.xlu0 %v239_v28 }
 0x138   :  { %v237_v29 = vpop.f32.mrf.mxu1 }
 0x1a8   :  { %v241_v30 = vpop.xlane.xlu0 %240 }
 0x1a9   :  { %v242_v31 = vmax.f32 %v241_v30, 1e-24 }
 0x1ab   :  { %361 = vrsqrt.f32 %v242_v31  ;;  %vm249_vm2 = vweird.f32 %v242_v31 }
 0x1b1   :  { %v362_v32 = vpop.eup %361 }
 0x1b2   :  { %v244_v33 = vmul.f32 %v362_v32, %v242_v31  ;;  %vm250_vm1 = vweird.f32 %v362_v32 }
 0x1b3   :  { %vm251_vm3 = vmor %vm249_vm2, %vm250_vm1 }
 0x1b4   :  { %v245_v34 = vmul.f32 %v362_v32, %v244_v33 }
 0x1b6   :  { %v246_v35 = vmul.f32 0.5, %v245_v34 }
 0x1b8   :  { %v247_v36 = vsub.f32 1.5, %v246_v35 }
 0x1ba   :  { %v248_v37 = vmul.f32 %v362_v32, %v247_v36 }
 0x1bc   :  { %v252_v38 = vsel %vm251_vm3, %v362_v32, %v248_v37 }
 0x1bd   :  { %v253_v39 = vmul.f32 %v252_v38, %v236_v27 }
 0x1bf   :  { %254 = vst [vmem:[#allocation9] sm:$0xff] %v253_v39 }
 0x1c0   :  { %265 = dma.vmem_to_hbm [thread:$0]  %s261_s5, 128, %s263_s18, [#allocation5]  }
 0x1c1   :  { %463 = dma.done.wait [#allocation5], 128  }
 0x1c2   :  { %464 = vsyncadd [#allocation5], 4294967168 }
 0x1c3   :  { %270 = vsyncpa [#allocation4], 1 }
 0x1c4   :  { %271 = vsyncpa [#allocation7], 1 }
 0x1c5   :  { %272 = vsyncpa [#allocation5], 1 }

</bundles_post_ra>
